<compile_context>
chip_gen: v7x
topology: tpu7x:2x2x1
jax: 0.10.0
libtpu: 0.0.40
codegen_flags: <defaults>
</compile_context>

<pallas_src>
import functools
import math

import jax
import jax.numpy as jnp
from jax.experimental import pallas as pl
from jax.experimental.pallas import tpu as pltpu

BN_EPS = 1e-5
_PAD = 16                        # channel / K padding: multiple of bf16 (16,128) and f32 (8,128) tiles
_LANE = 128                      # lane tile granularity
_VMEM_LIMIT = 32 * 1024 * 1024   # explicit scoped-VMEM limit, safe on v5e/v6e/v7x


def _round_up(v, m):
    return (v + m - 1) // m * m


# ---------------------------------------------------------------------------
# Pallas kernels
# ---------------------------------------------------------------------------

def _conv_stats_kernel(p_ref, w_ref, z_ref, sum_ref, ssq_ref):
    """One NHW lane tile: im2col conv matmul + single-pass BN partial stats.

    p_ref   : (K_pad, TN)    bf16  im2col patches tile (lane-dense)
    w_ref   : (C_pad, K_pad) bf16  folded 3x3 weights
    z_ref   : (C_pad, TN)    f32   conv output tile (lane-dense store)
    sum_ref : (1, C_pad, 1)  f32   per-tile per-channel sum(z)
    ssq_ref : (1, C_pad, 1)  f32   per-tile per-channel sum(z*z)
    """
    z = jnp.dot(w_ref[...], p_ref[...], preferred_element_type=jnp.float32)
    z_ref[...] = z
    sum_ref[0] = jnp.sum(z, axis=1, keepdims=True)
    ssq_ref[0] = jnp.sum(z * z, axis=1, keepdims=True)


def _bn_relu_kernel(z_ref, scale_ref, shift_ref, bn_ref, relu_ref):
    """Folded BN affine of the shortcut branch; bn is cached, relu(bn) is the step-0 out."""
    bn = z_ref[...] * scale_ref[...] + shift_ref[...]
    bn_ref[...] = bn
    relu_ref[...] = jnp.maximum(bn, 0.0)


def _bn_add_relu_kernel(z_ref, short_ref, scale_ref, shift_ref, out_ref):
    """out = relu( z*scale + shift + cached_shortcut_bn )  (single FMA epilogue)."""
    out_ref[...] = jnp.maximum(
        z_ref[...] * scale_ref[...] + shift_ref[...] + short_ref[...], 0.0)


# ---------------------------------------------------------------------------
# pallas_call wrappers
# ---------------------------------------------------------------------------

def _compiler_params():
    return pltpu.CompilerParams(dimension_semantics=("parallel",),
                                vmem_limit_bytes=_VMEM_LIMIT)


def _conv_stats(patches, w_mm, *, tn):
    k_pad, nhw_pad = patches.shape
    c_pad = w_mm.shape[0]
    n_tiles = nhw_pad // tn
    z, sums, ssqs = pl.pallas_call(
        _conv_stats_kernel,
        grid=(n_tiles,),
        in_specs=[
            pl.BlockSpec((k_pad, tn), lambda t: (0, t)),
            pl.BlockSpec((c_pad, k_pad), lambda t: (0, 0)),
        ],
        out_specs=(
            pl.BlockSpec((c_pad, tn), lambda t: (0, t)),
            pl.BlockSpec((1, c_pad, 1), lambda t: (t, 0, 0)),
            pl.BlockSpec((1, c_pad, 1), lambda t: (t, 0, 0)),
        ),
        out_shape=(
            jax.ShapeDtypeStruct((c_pad, nhw_pad), jnp.float32),
            jax.ShapeDtypeStruct((n_tiles, c_pad, 1), jnp.float32),
            jax.ShapeDtypeStruct((n_tiles, c_pad, 1), jnp.float32),
        ),
        compiler_params=_compiler_params(),
    )(patches, w_mm)
    # Cross-tile reduction of the tiny per-tile partials (fused under jit; keeps
    # the grid axis "parallel" so v7x megacore can shard the conv tiles).
    return z, jnp.sum(sums, axis=0), jnp.sum(ssqs, axis=0)


def _bn_relu(z, scale, shift, *, tn):
    c_pad, nhw_pad = z.shape
    n_tiles = nhw_pad // tn
    return pl.pallas_call(
        _bn_relu_kernel,
        grid=(n_tiles,),
        in_specs=[
            pl.BlockSpec((c_pad, tn), lambda t: (0, t)),
            pl.BlockSpec((c_pad, 1), lambda t: (0, 0)),
            pl.BlockSpec((c_pad, 1), lambda t: (0, 0)),
        ],
        out_specs=(
            pl.BlockSpec((c_pad, tn), lambda t: (0, t)),
            pl.BlockSpec((c_pad, tn), lambda t: (0, t)),
        ),
        out_shape=(
            jax.ShapeDtypeStruct((c_pad, nhw_pad), jnp.float32),
            jax.ShapeDtypeStruct((c_pad, nhw_pad), jnp.float32),
        ),
        compiler_params=_compiler_params(),
    )(z, scale, shift)


def _bn_add_relu(z, short_bn, scale, shift, *, tn):
    c_pad, nhw_pad = z.shape
    n_tiles = nhw_pad // tn
    return pl.pallas_call(
        _bn_add_relu_kernel,
        grid=(n_tiles,),
        in_specs=[
            pl.BlockSpec((c_pad, tn), lambda t: (0, t)),
            pl.BlockSpec((c_pad, tn), lambda t: (0, t)),
            pl.BlockSpec((c_pad, 1), lambda t: (0, 0)),
            pl.BlockSpec((c_pad, 1), lambda t: (0, 0)),
        ],
        out_specs=pl.BlockSpec((c_pad, tn), lambda t: (0, t)),
        out_shape=jax.ShapeDtypeStruct((c_pad, nhw_pad), jnp.float32),
        compiler_params=_compiler_params(),
    )(z, short_bn, scale, shift)


# ---------------------------------------------------------------------------
# Step helpers (jitted so the small wrapper ops fuse with the pallas calls)
# ---------------------------------------------------------------------------

def _im2col_cmajor(x_cnhw, k_pad, nhw_pad):
    """x (C,N,H,W) f32 -> patches (k_pad, nhw_pad) bf16, rows ordered c*9 + dy*3 + dx.

    Built channel-major so no 5-D transpose is needed (only pad + static slices).
    """
    C, N, H, W = x_cnhw.shape
    xp = jnp.pad(x_cnhw, ((0, 0), (0, 0), (1, 1), (1, 1)))
    taps = [xp[:, :, dy:dy + H, dx:dx + W] for dy in range(3) for dx in range(3)]
    p = jnp.stack(taps, axis=1)                          # (C, 9, N, H, W)
    p = p.reshape(C * 9, N * H * W)
    p = jnp.pad(p, ((0, k_pad - C * 9), (0, nhw_pad - N * H * W)))
    return p.astype(jnp.bfloat16)                        # bf16 MXU inputs (f32 accumulate)


def _bn_scale_shift(sum_c, ssq_c, gamma, beta, count):
    """Folded training-mode BN affine: scale = g*rsqrt(var+eps), shift = b - mean*scale."""
    c_pad = sum_c.shape[0]
    gamma = jnp.pad(gamma, (0, c_pad - gamma.shape[0]))[:, None]
    beta = jnp.pad(beta, (0, c_pad - beta.shape[0]))[:, None]
    mean = sum_c / count
    var = ssq_c / count - mean * mean                    # single-pass biased variance
    rstd = jax.lax.rsqrt(jnp.maximum(var, 0.0) + BN_EPS)
    scale = gamma * rstd
    shift = beta - mean * scale
    return scale, shift                                  # (c_pad, 1) each


def _unflatten_nchw(flat, N, C, H, W):
    return jnp.transpose(flat[:C, :N * H * W].reshape(C, N, H, W), (1, 0, 2, 3))


@functools.partial(jax.jit, static_argnames=("tn",))
def _shortcut_step(x_nchw, w_mm, gamma, beta, *, tn):
    """bn2[0](shortcut(x)) (cached, lane-dense flat), relu of it (flat + NCHW step-0 out)."""
    N, C, H, W = x_nchw.shape
    nhw = N * H * W
    _, k_pad = w_mm.shape
    nhw_pad = _round_up(nhw, tn)
    x_cm = jnp.transpose(x_nchw, (1, 0, 2, 3))           # one NCHW->CNHW transpose per input
    patches = _im2col_cmajor(x_cm, k_pad, nhw_pad)
    z, s, q = _conv_stats(patches, w_mm, tn=tn)
    scale, shift = _bn_scale_shift(s, q, gamma, beta, nhw)
    bn_flat, relu_flat = _bn_relu(z, scale, shift, tn=tn)
    return bn_flat, relu_flat, _unflatten_nchw(relu_flat, N, C, H, W)


@functools.partial(jax.jit, static_argnames=("shape", "tn"))
def _recurrent_step(last_flat, short_bn_flat, w_mm, gamma, beta, *, shape, tn):
    """relu( bn_i(conv(lastresult)) + cached bn2_0(shortcut(x)) ).

    lastresult is consumed in its lane-dense flat layout (no transpose round trip).
    """
    N, C, H, W = shape
    nhw = N * H * W
    _, k_pad = w_mm.shape
    nhw_pad = short_bn_flat.shape[1]
    last_cm = last_flat[:C, :nhw].reshape(C, N, H, W)    # padded rows/cols sliced away
    patches = _im2col_cmajor(last_cm, k_pad, nhw_pad)
    z, s, q = _conv_stats(patches, w_mm, tn=tn)
    scale, shift = _bn_scale_shift(s, q, gamma, beta, nhw)
    out_flat = _bn_add_relu(z, short_bn_flat, scale, shift, tn=tn)
    return out_flat, _unflatten_nchw(out_flat, N, C, H, W)


# ---------------------------------------------------------------------------
# Module
# ---------------------------------------------------------------------------

class SpikingRCLbn2_2:
    """Stateful JAX/Pallas port of the PyTorch SpikingRCLbn2_2 module."""

    def __init__(self, inplanes, steps=4, key=None, lane_tile=512):
        if key is None:
            key = jax.random.PRNGKey(0)
        assert lane_tile % _LANE == 0
        self.inplanes = inplanes
        self.steps = steps
        self.lane_tile = lane_tile
        self.c_pad = _round_up(inplanes, _PAD)
        self.k_pad = _round_up(9 * inplanes, _PAD)

        n = 3 * 3 * inplanes                        # PyTorch init: k*k*out_channels
        std = math.sqrt(2.0 / n)
        k1, k2 = jax.random.split(key)
        # PyTorch conv weight layout (Cout, Cin, 3, 3), bias=False.
        self.w_conv_pt = jax.random.normal(k1, (inplanes, inplanes, 3, 3), jnp.float32) * std
        self.w_short_pt = jax.random.normal(k2, (inplanes, inplanes, 3, 3), jnp.float32) * std
        # Folded matmul form (C_pad, 9*Cin padded), bf16 for the MXU.
        self.w_conv_mm = self._fold_weight(self.w_conv_pt)
        self.w_short_mm = self._fold_weight(self.w_short_pt)

        # BatchNorm params (PyTorch init: weight=1, bias=0) for bn[i] / bn2[i].
        self.bn_gamma = jnp.ones((steps, inplanes), jnp.float32)
        self.bn_beta = jnp.zeros((steps, inplanes), jnp.float32)
        self.bn2_gamma = jnp.ones((steps, inplanes), jnp.float32)
        self.bn2_beta = jnp.zeros((steps, inplanes), jnp.float32)

        self.i = 0
        self.lastresult = None         # user-facing NCHW (mirrors PyTorch attr)
        self._last_flat = None         # same tensor in lane-dense (C_pad, NHW_pad) layout
        self._cached_x = None          # identity of the input the shortcut cache came from
        self._short_bn = None          # bn2[0](shortcut(x)) in (C_pad, NHW_pad) layout
        self._short_relu_flat = None   # relu of the above, flat
        self._short_relu_nchw = None   # relu of the above == step-0 output, NCHW

    def _fold_weight(self, w_pt):
        cout, cin = w_pt.shape[:2]
        w2 = w_pt.reshape(cout, cin * 9)             # column index = cin*9 + dy*3 + dx
        w2 = jnp.pad(w2, ((0, self.c_pad - cout), (0, self.k_pad - cin * 9)))
        return w2.astype(jnp.bfloat16)

    def n_reset(self):
        self.i = 0
        self.lastresult = None
        self._last_flat = None
        self._cached_x = None
        self._short_bn = None
        self._short_relu_flat = None
        self._short_relu_nchw = None

    def _tile(self, nhw):
        return min(self.lane_tile, _round_up(nhw, _LANE))

    def __call__(self, x_nchw):
        N, C, H, W = x_nchw.shape
        assert C == self.inplanes
        assert self.i < self.steps, "called more times than `steps` (mirrors bn[self.i])"
        tn = self._tile(N * H * W)

        # Step-invariant branch: in training mode bn2[0](shortcut(x)) depends only
        # on x, so compute it once per distinct input object and cache it.
        if self._short_bn is None or self._cached_x is not x_nchw:
            self._short_bn, self._short_relu_flat, self._short_relu_nchw = _shortcut_step(
                x_nchw, self.w_short_mm, self.bn2_gamma[0], self.bn2_beta[0], tn=tn)
            self._cached_x = x_nchw

        if self.i == 0:
            out_flat, out = self._short_relu_flat, self._short_relu_nchw
        else:
            out_flat, out = _recurrent_step(
                self._last_flat, self._short_bn, self.w_conv_mm,
                self.bn_gamma[self.i], self.bn_beta[self.i],
                shape=(N, C, H, W), tn=tn)

        self.lastresult = out
        self._last_flat = out_flat
        self.i += 1
        return out


# ---------------------------------------------------------------------------
# Pure-JAX reference (mirrors PyTorch forward; emulates the kernel's bf16
# quantization of the conv/matmul inputs, f32 everywhere else).
# ---------------------------------------------------------------------------

def _ref_conv3x3(x, w):
    xq = x.astype(jnp.bfloat16).astype(jnp.float32)
    wq = w.astype(jnp.bfloat16).astype(jnp.float32)
    return jax.lax.conv_general_dilated(
        xq, wq, window_strides=(1, 1), padding=((1, 1), (1, 1)),
        dimension_numbers=("NCHW", "OIHW", "NCHW"))


def _ref_bn(z, gamma, beta):
    mean = jnp.mean(z, axis=(0, 2, 3), keepdims=True)
    var = jnp.mean((z - mean) ** 2, axis=(0, 2, 3), keepdims=True)
    zn = (z - mean) * jax.lax.rsqrt(var + BN_EPS)
    return zn * gamma[None, :, None, None] + beta[None, :, None, None]


def _ref_forward(module, x, steps):
    last = None
    for i in range(steps):
        short = _ref_bn(_ref_conv3x3(x, module.w_short_pt),
                        module.bn2_gamma[0], module.bn2_beta[0])
        if i == 0:
            z = short
        else:
            z = _ref_bn(_ref_conv3x3(last, module.w_conv_pt),
                        module.bn_gamma[i], module.bn_beta[i]) + short
        last = jnp.maximum(z, 0.0)
    return last


if __name__ == "__main__":
    key = jax.random.PRNGKey(0)
    k_params, k_input = jax.random.split(key)

    N, C, H, W = 2, 4, 16, 16
    steps = 4

    # lane_tile=256 -> NHW=512 splits into a 2-tile "parallel" grid, exercising
    # the tiled pipeline and the cross-tile BN partial-sum reduction path.
    module = SpikingRCLbn2_2(C, steps=steps, key=k_params, lane_tile=256)
    x = jax.random.normal(k_input, (N, C, H, W), jnp.float32)

    module.n_reset()
    out = None
    for _ in range(steps):
        out = module(x)              # recurrent: uses lastresult for i > 0
    out = jax.block_until_ready(out)

    assert out.shape == (N, C, H, W)
    assert out.dtype == jnp.float32
    assert bool(jnp.all(out >= 0.0))          # ReLU output

    # Numerical check vs. a pure-JAX reference of the PyTorch forward.
    ref = jax.block_until_ready(_ref_forward(module, x, steps))
    max_err = float(jnp.max(jnp.abs(out - ref)))
    # Tolerance covers bf16 rounding-boundary divergence between the im2col
    # matmul kernel and the lax.conv reference across the 4 recurrent steps.
    assert max_err < 5e-2, f"mismatch vs reference: max|diff|={max_err}"

    print("KERNEL_OK")
</pallas_src>

<mosaic_0001>
module attributes {stable_mosaic.version = 11 : i64} {
  func.func @_conv_stats_kernel(%arg0: i32, %arg1: memref<48x256xbf16, #tpu.memory_space<vmem>>, %arg2: memref<16x48xbf16, #tpu.memory_space<vmem>>, %arg3: memref<16x256xf32, #tpu.memory_space<vmem>>, %arg4: memref<1x16x1xf32, #tpu.memory_space<vmem>>, %arg5: memref<1x16x1xf32, #tpu.memory_space<vmem>>) attributes {dimension_semantics = [#tpu.dimension_semantics<parallel>], iteration_bounds = array<i64: 2>, scalar_prefetch = 0 : i64, scratch_operands = 0 : i64, tpu.core_type = #tpu.core_type<tc>, window_params = [{transform_indices = @transform_0, window_bounds = array<i64: 48, 256>}, {pipeline_mode = #tpu.pipeline_mode<synchronous>, transform_indices = @transform_1, window_bounds = array<i64: 16, 48>}, {transform_indices = @transform_2, window_bounds = array<i64: 16, 256>}, {transform_indices = @transform_3, window_bounds = array<i64: 1, 16, 1>}, {transform_indices = @transform_4, window_bounds = array<i64: 1, 16, 1>}]} {
    %c0 = arith.constant 0 : index
    %c0_0 = arith.constant 0 : index
    %0 = vector.load %arg2[%c0, %c0_0] : memref<16x48xbf16, #tpu.memory_space<vmem>>, vector<16x48xbf16>
    %c0_1 = arith.constant 0 : index
    %c0_2 = arith.constant 0 : index
    %1 = vector.load %arg1[%c0_1, %c0_2] : memref<48x256xbf16, #tpu.memory_space<vmem>>, vector<48x256xbf16>
    %cst = arith.constant dense<0.000000e+00> : vector<16x256xf32>
    %2 = tpu.matmul %0, %1, %cst {dimension_numbers = #tpu.dot_dimension_numbers<[1], [0], [0], [1], [0, 0, 1, 1], [], []>} : vector<16x48xbf16>, vector<48x256xbf16>, vector<16x256xf32> -> vector<16x256xf32>
    %c0_3 = arith.constant 0 : index
    %c0_4 = arith.constant 0 : index
    %3 = vector.load %arg3[%c0_3, %c0_4] : memref<16x256xf32, #tpu.memory_space<vmem>>, vector<16x256xf32>
    tpu.vector_store %arg3[%c0_3, %c0_4], %2 {strides = array<i32>} : memref<16x256xf32, #tpu.memory_space<vmem>>, vector<16x256xf32>,
    %cst_5 = arith.constant dense<0.000000e+00> : vector<16xf32>
    %4 = vector.multi_reduction <add>, %2, %cst_5 [1] : vector<16x256xf32> to vector<16xf32>
    %5 = vector.shape_cast %4 : vector<16xf32> to vector<16x1xf32>
    %c0_6 = arith.constant 0 : index
    %c0_7 = arith.constant 0 : index
    %c0_8 = arith.constant 0 : index
    %6 = vector.load %arg4[%c0_6, %c0_7, %c0_8] : memref<1x16x1xf32, #tpu.memory_space<vmem>>, vector<1x16x1xf32>
    %7 = vector.shape_cast %6 : vector<1x16x1xf32> to vector<16x1xf32>
    %8 = vector.shape_cast %5 : vector<16x1xf32> to vector<1x16x1xf32>
    tpu.vector_store %arg4[%c0_6, %c0_7, %c0_8], %8 {strides = array<i32>} : memref<1x16x1xf32, #tpu.memory_space<vmem>>, vector<1x16x1xf32>,
    %9 = arith.mulf %2, %2 : vector<16x256xf32>
    %cst_9 = arith.constant dense<0.000000e+00> : vector<16xf32>
    %10 = vector.multi_reduction <add>, %9, %cst_9 [1] : vector<16x256xf32> to vector<16xf32>
    %11 = vector.shape_cast %10 : vector<16xf32> to vector<16x1xf32>
    %c0_10 = arith.constant 0 : index
    %c0_11 = arith.constant 0 : index
    %c0_12 = arith.constant 0 : index
    %12 = vector.load %arg5[%c0_10, %c0_11, %c0_12] : memref<1x16x1xf32, #tpu.memory_space<vmem>>, vector<1x16x1xf32>
    %13 = vector.shape_cast %12 : vector<1x16x1xf32> to vector<16x1xf32>
    %14 = vector.shape_cast %11 : vector<16x1xf32> to vector<1x16x1xf32>
    tpu.vector_store %arg5[%c0_10, %c0_11, %c0_12], %14 {strides = array<i32>} : memref<1x16x1xf32, #tpu.memory_space<vmem>>, vector<1x16x1xf32>,
    return
  }
  func.func @transform_0(%arg0: i32) -> (i32, i32) {
    %c0_i32 = arith.constant 0 : i32
    %c0_i32_0 = arith.constant 0 : i32
    return %c0_i32, %arg0 : i32, i32
  }
  func.func @transform_1(%arg0: i32) -> (i32, i32) {
    %c0_i32 = arith.constant 0 : i32
    %c0_i32_0 = arith.constant 0 : i32
    %c0_i32_1 = arith.constant 0 : i32
    return %c0_i32, %c0_i32_0 : i32, i32
  }
  func.func @transform_2(%arg0: i32) -> (i32, i32) {
    %c0_i32 = arith.constant 0 : i32
    %c0_i32_0 = arith.constant 0 : i32
    return %c0_i32, %arg0 : i32, i32
  }
  func.func @transform_3(%arg0: i32) -> (i32, i32, i32) {
    %c0_i32 = arith.constant 0 : i32
    %c0_i32_0 = arith.constant 0 : i32
    %c0_i32_1 = arith.constant 0 : i32
    return %arg0, %c0_i32, %c0_i32_0 : i32, i32, i32
  }
  func.func @transform_4(%arg0: i32) -> (i32, i32, i32) {
    %c0_i32 = arith.constant 0 : i32
    %c0_i32_0 = arith.constant 0 : i32
    %c0_i32_1 = arith.constant 0 : i32
    return %arg0, %c0_i32, %c0_i32_0 : i32, i32, i32
  }
}

module attributes {stable_mosaic.version = 11 : i64} {
  func.func @_bn_relu_kernel(%arg0: i32, %arg1: memref<16x256xf32, #tpu.memory_space<vmem>>, %arg2: memref<16x1xf32, #tpu.memory_space<vmem>>, %arg3: memref<16x1xf32, #tpu.memory_space<vmem>>, %arg4: memref<16x256xf32, #tpu.memory_space<vmem>>, %arg5: memref<16x256xf32, #tpu.memory_space<vmem>>) attributes {dimension_semantics = [#tpu.dimension_semantics<parallel>], iteration_bounds = array<i64: 2>, scalar_prefetch = 0 : i64, scratch_operands = 0 : i64, tpu.core_type = #tpu.core_type<tc>, window_params = [{transform_indices = @transform_0, window_bounds = array<i64: 16, 256>}, {pipeline_mode = #tpu.pipeline_mode<synchronous>, transform_indices = @transform_1, window_bounds = array<i64: 16, 1>}, {pipeline_mode = #tpu.pipeline_mode<synchronous>, transform_indices = @transform_2, window_bounds = array<i64: 16, 1>}, {transform_indices = @transform_3, window_bounds = array<i64: 16, 256>}, {transform_indices = @transform_4, window_bounds = array<i64: 16, 256>}]} {
    %c0 = arith.constant 0 : index
    %c0_0 = arith.constant 0 : index
    %0 = vector.load %arg1[%c0, %c0_0] : memref<16x256xf32, #tpu.memory_space<vmem>>, vector<16x256xf32>
    %c0_1 = arith.constant 0 : index
    %c0_2 = arith.constant 0 : index
    %1 = vector.load %arg2[%c0_1, %c0_2] : memref<16x1xf32, #tpu.memory_space<vmem>>, vector<16x1xf32>
    %2 = vector.broadcast %1 : vector<16x1xf32> to vector<16x256xf32>
    %3 = arith.mulf %0, %2 : vector<16x256xf32>
    %c0_3 = arith.constant 0 : index
    %c0_4 = arith.constant 0 : index
    %4 = vector.load %arg3[%c0_3, %c0_4] : memref<16x1xf32, #tpu.memory_space<vmem>>, vector<16x1xf32>
    %5 = vector.broadcast %4 : vector<16x1xf32> to vector<16x256xf32>
    %6 = arith.addf %3, %5 : vector<16x256xf32>
    %c0_5 = arith.constant 0 : index
    %c0_6 = arith.constant 0 : index
    %7 = vector.load %arg4[%c0_5, %c0_6] : memref<16x256xf32, #tpu.memory_space<vmem>>, vector<16x256xf32>
    tpu.vector_store %arg4[%c0_5, %c0_6], %6 {strides = array<i32>} : memref<16x256xf32, #tpu.memory_space<vmem>>, vector<16x256xf32>,
    %cst = arith.constant 0.000000e+00 : f32
    %8 = vector.broadcast %cst : f32 to vector<16x256xf32>
    %9 = arith.maximumf %6, %8 : vector<16x256xf32>
    %c0_7 = arith.constant 0 : index
    %c0_8 = arith.constant 0 : index
    %10 = vector.load %arg5[%c0_7, %c0_8] : memref<16x256xf32, #tpu.memory_space<vmem>>, vector<16x256xf32>
    tpu.vector_store %arg5[%c0_7, %c0_8], %9 {strides = array<i32>} : memref<16x256xf32, #tpu.memory_space<vmem>>, vector<16x256xf32>,
    return
  }
  func.func @transform_0(%arg0: i32) -> (i32, i32) {
    %c0_i32 = arith.constant 0 : i32
    %c0_i32_0 = arith.constant 0 : i32
    return %c0_i32, %arg0 : i32, i32
  }
  func.func @transform_1(%arg0: i32) -> (i32, i32) {
    %c0_i32 = arith.constant 0 : i32
    %c0_i32_0 = arith.constant 0 : i32
    %c0_i32_1 = arith.constant 0 : i32
    return %c0_i32, %c0_i32_0 : i32, i32
  }
  func.func @transform_2(%arg0: i32) -> (i32, i32) {
    %c0_i32 = arith.constant 0 : i32
    %c0_i32_0 = arith.constant 0 : i32
    %c0_i32_1 = arith.constant 0 : i32
    return %c0_i32, %c0_i32_0 : i32, i32
  }
  func.func @transform_3(%arg0: i32) -> (i32, i32) {
    %c0_i32 = arith.constant 0 : i32
    %c0_i32_0 = arith.constant 0 : i32
    return %c0_i32, %arg0 : i32, i32
  }
  func.func @transform_4(%arg0: i32) -> (i32, i32) {
    %c0_i32 = arith.constant 0 : i32
    %c0_i32_0 = arith.constant 0 : i32
    return %c0_i32, %arg0 : i32, i32
  }
}

</mosaic_0001>

<bundles_post_ra>
// kernel: _shortcut_step.3
= control target key start
LH: loop header
LB: loop body
LE: loop exit
PB: predicated region body
PF: predicated region fallthrough
CT: control target
= control target key end

     0   :  { %10 = vsyncpa [#allocation4], 0  ;;  %s723_s0 = inlined_call_operand.vmem [shape: f32[16,512], index: 0, kind: input, shape index: {}]   ;;  %s724_s1 = inlined_call_operand.vmem [shape: f32[16,1], index: 1, kind: input, shape index: {}]   ;;  %s725_s2 = inlined_call_operand.vmem [shape: f32[16,1], index: 2, kind: input, shape index: {}]   ;;  %s726_s3 = inlined_call_operand.hbm [shape: f32[16,512], index: 3, kind: output, shape index: {0}]   ;;  %s727_s4 = inlined_call_operand.vmem [shape: f32[16,512], index: 4, kind: output, shape index: {1}]  }
   0x1   :  { %12 = vsyncpa [#allocation4 + $0x1], 0  ;;  %s583_s15 = smov 0   ;;  %s585_s16 = smov 0  }
   0x2   :  { %s587_s17 = smov 0   ;;  %s589_s18 = smov 0  }
   0x3 LB: > { %s604_s19 = sadd.s32 4294967295, %s551_s18   ;;  %s423_s20 = sadd.s32 4294967294, %s551_s18   ;;  %s551_s18 = sphi %s589_s18, %s733_s18   ;;  %s547_s17 = sphi %s587_s17, %s732_s17   ;;  %s543_s16 = sphi %s585_s16, %s731_s16   ;;  %s539_s15 = sphi %s583_s15, %s730_s15  }
   0x4   : > { %s608_s21 = sadd.s32 1, %s551_s18   ;;  %s25_s22 = sadd.s32 1, %s547_s17 }
   0x5   : > { %s22_s23 = ssub.s32 %s551_s18, %s608_s21  ;;  %p32_p0 = scmp.ne.s32.totalorder %s547_s17, %s543_s16 }
   0x6   : > { %p23_p1 = scmp.eq.s32.totalorder %s22_s23, 0  ;;  %p33_p2 = scmp.eq.s32.totalorder %s551_s18, 0 }
   0x7   : > { %p104_p3 = scmp.eq.s32.totalorder %s604_s19, 1  ;;  %p109_p4 = scmp.ne.s32.totalorder %s543_s16, %s539_s15 }
   0x8   : > { %s620_s24 = scalar_select %p23_p1, %s547_s17, %s25_s22  }
   0x9   : > { %p34_p5 = por %p33_p2, %p32_p0  ;;  %p622_p6 = por %p104_p3, %p32_p0 }
   0xa   : > { %p110_p7 = scmp.eq.s32.totalorder %s423_s20, 1  ;;  %p425_p9 = scmp.ge.s32.totalorder %s551_s18, 2 }
   0xc   : > { %p626_p8 = por %p110_p7, %p109_p4  ;;  %158 = sbr.rel (%p425_p9) target bundleno = 26 (0x1a), region = 24 }
  0x13   : > { %161 = sbr.rel (!%p34_p5) target bundleno = 26 (0x1a), region = 28  ;;  %s163_s27 = sand.u32 (%p34_p5), 1, %s547_s17  }
  0x14   : > { %s441_s28 = sshll.u32 (%p34_p5), %s551_s18, 4  ;;  %s426_s29 = sshll.u32 (%p34_p5), %s163_s27, 5 }
  0x15   : > { %s168_s6 = scalar_lea.vmem (%p34_p5), %s723_s0, %s441_s28  ;;  %s165_s7 = scalar_lea.vmem (%p34_p5), [#allocation2], %s426_s29 }
  0x16   : > { %v181_v0 = vld [vmem:[%s168_s6] sm:$0xff] (%p34_p5)  ;;  %v183_v1 = vld [vmem:[%s168_s6 + $0x8] sm:$0xff] (%p34_p5) }
  0x17   : > { %v185_v2 = vld [vmem:[%s168_s6 + $0x20] sm:$0xff] (%p34_p5)  ;;  %182 = vst [vmem:[%s165_s7] sm:$0xff] (%p34_p5), %v181_v0  ;;  %184 = vst [vmem:[%s165_s7 + $0x8] sm:$0xff] (%p34_p5), %v183_v1  ;;  %v187_v3 = vld [vmem:[%s168_s6 + $0x28] sm:$0xff] (%p34_p5) }
  0x18   : > { %186 = vst [vmem:[%s165_s7 + $0x10] sm:$0xff] (%p34_p5), %v185_v2  ;;  %188 = vst [vmem:[%s165_s7 + $0x18] sm:$0xff] (%p34_p5), %v187_v3 }
  0x1a PF: > { %p429_p10 = scmp.ge.s32.totalorder %s551_s18, 1  ;;  %p193_p11 = scmp.lt.s32.totalorder %s551_s18, 3 }
  0x1c   : > { %p194_p12 = pnand %p429_p10, %p193_p11 }
  0x1d   : > { %v252_v4 = vld [vmem:[%s725_s2] sm:$0xff] (!%p194_p12)  ;;  %v553_v6 = vmov (!%p194_p12), 0   ;;  %v253_v7 = vld [vmem:[%s725_s2 + $0x8] sm:$0xff] (!%p194_p12)  ;;  %s200_s22 = sand.u32 (!%p194_p12), 1, %s543_s16   ;;  %s442_s30 = sshll.u32 (!%p194_p12), %s604_s19, 8 }
  0x1e   : > { %197 = sbr.rel (%p194_p12) target bundleno = 189 (0xbd), region = 51  ;;  %v236_v5 = vld [vmem:[%s724_s1] sm:$0xff] (!%p194_p12)  ;;  %488 = vset.pattern.permute.xlu1 (!%p194_p12), %v553_v6  ;;  %487 = vset.pattern.permute.xlu0 (!%p194_p12), %v553_v6  ;;  %v237_v8 = vld [vmem:[%s724_s1 + $0x8] sm:$0xff] (!%p194_p12)  ;;  %s430_s23 = sshll.u32 (!%p194_p12), %s200_s22, 5 }
  0x1f   : > { %256 = vperm.xlu1 (!%p194_p12), %488, %v252_v4   ;;  %240 = vperm.xlu0 (!%p194_p12), %487, %v236_v5   ;;  %s202_s27 = scalar_lea.vmem (!%p194_p12), [#allocation2], %s430_s23  ;;  %s222_s28 = scalar_lea.vmem (!%p194_p12), [#allocation3], %s430_s23 }
  0x20   : > { %v232_v9 = vld [vmem:[%s202_s27] sm:$0xff] (!%p194_p12)  ;;  %v233_v10 = vld [vmem:[%s202_s27 + $0x8] sm:$0xff] (!%p194_p12)  ;;  %s298_s29 = sshll.u32 (!%p194_p12), %s222_s28, 4  ;;  %v234_v15 = vld [vmem:[%s202_s27 + $0x10] sm:$0xff] (!%p194_p12)  ;;  %s661_s7 = scalar_lea.hbm (!%p194_p12), %s726_s3, %s442_s30  ;;  %s656_s29 = int_to_ptr.vmem [resolvable:$true] %s298_s29 }
  0x21   : > { %v235_v16 = vld [vmem:[%s202_s27 + $0x18] sm:$0xff] (!%p194_p12)  ;;  %s663_s8 = scalar_lea.vmem (!%p194_p12), [#allocation5], %s430_s23  ;;  %s669_s9 = scalar_lea.sflag (!%p194_p12), [#allocation4], %s200_s22 }
  0x22   : > { %s489_s10 = scalar_lea.vmem (!%p194_p12), %s656_s29, 512  ;;  %s554_s11 = smov (!%p194_p12), [#allocation3]  }
  0x23   : > { %261 = vperm.xlu1 (!%p194_p12), %488, %v253_v7   ;;  %245 = vperm.xlu0 (!%p194_p12), %487, %v237_v8   ;;  %p490_p13 = scmp.ne.s32.totalorder (!%p194_p12), %s656_s29, %s489_s10  ;;  %s493_s12 = sshll.u32 (!%p194_p12), %s554_s11, 4  ;;  %s494_s12 = int_to_ptr.vmem [resolvable:$false] %s493_s12 }
  0x24   : > { %s495_s13 = scalar_lea.vmem (!%p194_p12), %s494_s12, 1024  ;;  %p496_p2 = scmp.lt.s32.totalorder (!%p194_p12), %s656_s29, %s494_s12 }
  0x25   : > { %p491_p0 = pnand %p490_p13, %p622_p6  ;;  %p497_p3 = scmp.lt.s32.totalorder %s495_s13, %s489_s10 }
  0x27   : > { %p492_p1 = pneg %p491_p0  ;;  %p498_p4 = por %p497_p3, %p496_p2 }
  0x29   : > { %p499_p5 = pnand %p498_p4, %p492_p1 }
  0x9e   : > { %v257_v11 = vpop.permute.xlu1 %256  ;;  %v241_v12 = vpop.permute.xlu0 %240 }
  0x9f   : > { %v248_v13 = vmul.f32 %v241_v12, %v232_v9  ;;  %v249_v14 = vmul.f32 %v241_v12, %v233_v10 }
  0xa1   : > { %v264_v17 = vadd.f32 %v257_v11, %v248_v13  ;;  %v265_v18 = vadd.f32 %v257_v11, %v249_v14 }
  0xa2   : > { %v246_v19 = vpop.permute.xlu0 %245  ;;  %v262_v24 = vpop.permute.xlu1 %261 }
  0xa3   : > { %268 = vst [vmem:[%s222_s28] sm:$0xff] %v264_v17  ;;  %269 = vst [vmem:[%s222_s28 + $0x8] sm:$0xff] %v265_v18  ;;  %v272_v20 = vmax.f32 %v264_v17, 0.0  ;;  %v273_v21 = vmax.f32 %v265_v18, 0.0  ;;  %v250_v22 = vmul.f32 %v246_v19, %v234_v15  ;;  %v251_v23 = vmul.f32 %v246_v19, %v235_v16 }
  0xa5   : > { %276 = vst [vmem:[%s663_s8] sm:$0xff] %v272_v20  ;;  %277 = vst [vmem:[%s663_s8 + $0x8] sm:$0xff] %v273_v21  ;;  %v266_v25 = vadd.f32 %v262_v24, %v250_v22  ;;  %v267_v26 = vadd.f32 %v262_v24, %v251_v23 }
  0xa7   : > { %270 = vst [vmem:[%s222_s28 + $0x10] sm:$0xff] %v266_v25  ;;  %271 = vst [vmem:[%s222_s28 + $0x18] sm:$0xff] %v267_v26  ;;  %v274_v27 = vmax.f32 %v266_v25, 0.0  ;;  %v275_v28 = vmax.f32 %v267_v26, 0.0 }
  0xa8   : > { %502 = shalt.err (!%p499_p5)
}
  0xa9   : > { %s503_s14 = scalar_lea.hbm %s661_s7, 512  ;;  %s507_s23 = scalar_lea.hbm %s726_s3, 1024 }
  0xaa   : > { %p504_p7 = scmp.ne.s32.totalorder %s661_s7, %s503_s14  ;;  %p508_p12 = scmp.lt.u32.totalorder %s661_s7, %s726_s3 }
  0xab   : > { %p509_p13 = scmp.lt.u32.totalorder %s507_s23, %s503_s14  ;;  %p511_p1 = scmp.lt.u32.totalorder %s503_s14, %s661_s7 }
  0xac   : > { %p505_p10 = pnand %p504_p7, %p622_p6 }
  0xad   : > { %p510_p0 = por %p509_p13, %p508_p12 }
  0xae   : > { %p506_p11 = pneg %p505_p10 }
  0xaf   : > { %p512_p2 = por %p511_p1, %p510_p0 }
  0xb1   : > { %p513_p3 = pnand %p512_p2, %p506_p11 }
  0xb3   : > { %516 = shalt.err (!%p513_p3)
}
  0xb4   : > { %s555_s30 = smov 256   ;;  %s556_s5 = smov 512   ;;  %278 = vst [vmem:[%s663_s8 + $0x10] sm:$0xff] %v274_v27  ;;  %279 = vst [vmem:[%s663_s8 + $0x18] sm:$0xff] %v275_v28  ;;  %v323_v29 = vld [vmem:[%s663_s8] sm:$0xff] (%p622_p6)  ;;  %v325_v30 = vld [vmem:[%s663_s8 + $0x8] sm:$0xff] (%p622_p6) }
  0xb5   : > { %s557_s6 = smov 16   ;;  %307 = sbr.rel (!%p622_p6) target bundleno = 189 (0xbd), region = 63 }
  0xb6   : > { %444 = dma.vmem_to_hbm [thread:$0]  (%p622_p6), %s656_s29, 512, %s661_s7, %s669_s9, %s555_s30, %s556_s5, %s557_s6  }
  0xb7   : > { %s443_s10 = sshll.u32 (%p622_p6), %s604_s19, 4 }
  0xb8   : > { %s310_s13 = scalar_lea.vmem (%p622_p6), %s727_s4, %s443_s10 }
  0xb9   : > { %324 = vst [vmem:[%s310_s13] sm:$0xff] (%p622_p6), %v323_v29  ;;  %326 = vst [vmem:[%s310_s13 + $0x8] sm:$0xff] (%p622_p6), %v325_v30 }
  0xbb   : > { %v327_v31 = vld [vmem:[%s663_s8 + $0x10] sm:$0xff] (%p622_p6)  ;;  %v329_v32 = vld [vmem:[%s663_s8 + $0x18] sm:$0xff] (%p622_p6) }
  0xbc   : > { %328 = vst [vmem:[%s310_s13 + $0x20] sm:$0xff] %v327_v31  ;;  %330 = vst [vmem:[%s310_s13 + $0x28] sm:$0xff] %v329_v32 }
  0xbd PF: > { %s342_s25 = sand.u32 1, %s539_s15   ;;  %p447_p6 = pnand %p425_p9, %p626_p8 }
  0xbe   : > { %s343_s19 = scalar_lea.sflag [#allocation4], %s342_s25 }
  0xbf   : > { %534 = dma.done.wait (!%p447_p6), %s343_s19, 512  }
  0xc0   : > { %536 = vsyncadd (!%p447_p6), %s343_s19, 4294966784  ;;  %p15_p4 = scmp.ge.s32.totalorder %s608_s21, 4   ;;  %s730_s15 = smov %s543_s16 }
  0xc1   : > { %s731_s16 = smov %s547_s17  ;;  %s732_s17 = smov %s620_s24 }
  0xc2   : > { %s733_s18 = smov %s608_s21  ;;  %17 = sbr.rel (!%p15_p4) target bundleno = 3 (0x3), region = 130 }
  0xc9   :  { %355 = vsyncpa [#allocation4], 1 }
  0xca   :  { %357 = vsyncpa [#allocation4 + $0x1], 1 }

// kernel: _shortcut_step.2
= control target key start
LH: loop header
LB: loop body
LE: loop exit
PB: predicated region body
PF: predicated region fallthrough
CT: control target
= control target key end

     0   :  { %s661_s15 = smov 0   ;;  %s663_s16 = smov 0   ;;  %s742_s0 = inlined_call_operand.vmem [shape: bf16[48,512], index: 0, kind: input, shape index: {}]   ;;  %s743_s1 = inlined_call_operand.vmem [shape: bf16[16,48], index: 1, kind: input, shape index: {}]   ;;  %s744_s2 = inlined_call_operand.vmem [shape: f32[16,512], index: 2, kind: output, shape index: {0}]   ;;  %s745_s3 = inlined_call_operand.vmem [shape: f32[2,16,1], index: 3, kind: output, shape index: {1}]   ;;  %s746_s4 = inlined_call_operand.vmem [shape: f32[2,16,1], index: 4, kind: output, shape index: {2}]  }
   0x1   :  { %s665_s17 = smov 0  }
   0x2 LB: > { %s677_s18 = sadd.s32 4294967295, %s633_s17   ;;  %s680_s19 = sadd.s32 1, %s633_s17   ;;  %s633_s17 = sphi %s665_s17, %s750_s17   ;;  %s629_s16 = sphi %s663_s16, %s749_s16   ;;  %s625_s15 = sphi %s661_s15, %s748_s15  }
   0x3   : > { %s19_s20 = ssub.s32 %s633_s17, %s680_s19  ;;  %s22_s21 = sadd.s32 1, %s629_s16 }
   0x4   : > { %p20_p0 = scmp.eq.s32.totalorder %s19_s20, 0  ;;  %p29_p1 = scmp.ne.s32.totalorder %s629_s16, %s625_s15 }
   0x5   : > { %p30_p2 = scmp.eq.s32.totalorder %s633_s17, 0  ;;  %p80_p3 = scmp.eq.s32.totalorder %s677_s18, 1 }
   0x6   : > { %s690_s22 = scalar_select %p20_p0, %s629_s16, %s22_s21  }
   0x7   : > { %p31_p4 = por %p30_p2, %p29_p1  ;;  %p692_p5 = por %p80_p3, %p29_p1 }
   0x8   : > { %p548_p6 = scmp.ge.s32.totalorder %s633_s17, 2 }
   0xa   : > { %157 = sbr.rel (%p548_p6) target bundleno = 24 (0x18), region = 20 }
  0x11   : > { %160 = sbr.rel (!%p31_p4) target bundleno = 24 (0x18), region = 24  ;;  %s162_s24 = sand.u32 (%p31_p4), 1, %s629_s16  }
  0x12   : > { %s570_s25 = sshll.u32 (%p31_p4), %s633_s17, 3  ;;  %s574_s26 = smul.u32 (%p31_p4), 48, %s162_s24 }
  0x13   : > { %s167_s29 = scalar_lea.vmem (%p31_p4), %s742_s0, %s570_s25 }
  0x14   : > { %v205_v0 = vld [vmem:[%s167_s29] sm:$0xff] (%p31_p4)  ;;  %v207_v1 = vld [vmem:[%s167_s29 + $0x10] sm:$0xff] (%p31_p4)  ;;  %s164_s30 = scalar_lea.vmem (%p31_p4), [#allocation2], %s574_s26 }
  0x15   : > { %v209_v2 = vld [vmem:[%s167_s29 + $0x20] sm:$0xff] (%p31_p4)  ;;  %v211_v3 = vld [vmem:[%s167_s29 + $0x30] sm:$0xff] (%p31_p4)  ;;  %206 = vst [vmem:[%s164_s30] sm:$0xff] (%p31_p4), %v205_v0  ;;  %208 = vst [vmem:[%s164_s30 + $0x8] sm:$0xff] (%p31_p4), %v207_v1 }
  0x16   : > { %v213_v4 = vld [vmem:[%s167_s29 + $0x40] sm:$0xff] (%p31_p4)  ;;  %v215_v5 = vld [vmem:[%s167_s29 + $0x50] sm:$0xff] (%p31_p4)  ;;  %210 = vst [vmem:[%s164_s30 + $0x10] sm:$0xff] (%p31_p4), %v209_v2  ;;  %212 = vst [vmem:[%s164_s30 + $0x18] sm:$0xff] (%p31_p4), %v211_v3 }
  0x17   : > { %214 = vst [vmem:[%s164_s30 + $0x20] sm:$0xff] (%p31_p4), %v213_v4  ;;  %216 = vst [vmem:[%s164_s30 + $0x28] sm:$0xff] (%p31_p4), %v215_v5 }
  0x18 PF: > { %p551_p7 = scmp.ge.s32.totalorder %s633_s17, 1  ;;  %p221_p8 = scmp.lt.s32.totalorder %s633_s17, 3 }
  0x1a   : > { %p222_p9 = pnand %p551_p7, %p221_p8 }
  0x1b   : > { %s228_s5 = sand.u32 (!%p222_p9), 1, %s625_s15   ;;  %v635_v6 = vmov (!%p222_p9), 0   ;;  %v610_v13 = vld [vmem:[%s743_s1] sm:$0xff] (!%p222_p9)   ;;  %vm318_vm0 = vcmask (!%p222_p9), 392192   ;;  %p264_p10 = scmp.lt.s32.totalorder (!%p222_p9), %s677_s18, 1  ;;  %vm375_vm1 = vcmask (!%p222_p9), 7168  }
  0x1c   : > { %225 = sbr.rel (%p222_p9) target bundleno = 409 (0x199), region = 62  ;;  %354 = vmatprep.mubr.bf16.mxu0 (!%p222_p9), %v635_v6  ;;  %s552_s10 = sshll.u32 (!%p222_p9), %s228_s5, 5 }
  0x1d   : > { %s575_s6 = smul.u32 (!%p222_p9), 48, %s228_s5  ;;  %s708_s11 = scalar_lea.vmem (!%p222_p9), [#allocation3], %s552_s10 }
  0x1f   : > { %s230_s7 = scalar_lea.vmem (!%p222_p9), [#allocation2], %s575_s6 }
  0x20   : > { %v601_v7 = vld [vmem:[%s230_s7 + $0x4] ss:$8 sps:$4 sm:$0xff] (!%p222_p9)   ;;  %v603_v8 = vld [vmem:[%s230_s7] ss:$8 sps:$4 sm:$0xff] (!%p222_p9)   ;;  %v604_v9 = vld [vmem:[%s230_s7 + $0x14] ss:$8 sps:$4 sm:$0xff] (!%p222_p9)  }
  0x21   : > { %322 = vmatprep.subr.bf16.mxu0 (!%p222_p9), %v601_v7  ;;  %v606_v10 = vld [vmem:[%s230_s7 + $0x10] ss:$8 sps:$4 sm:$0xff] (!%p222_p9)   ;;  %v607_v11 = vld [vmem:[%s230_s7 + $0x24] ss:$8 sps:$4 sm:$0xff] (!%p222_p9)   ;;  %v609_v12 = vld [vmem:[%s230_s7 + $0x20] ss:$8 sps:$4 sm:$0xff] (!%p222_p9)  }
  0x22   : > { %323 = vmatpush1.bf16.msra.mxu0 (!%p222_p9), %v603_v8 }
  0x23   : > { %324 = vmatprep.subr.bf16.mxu0 %v604_v9  ;;  %s265_s12 = scalar_select %p264_p10, %s677_s18, 1 }
  0x24   : > { %s573_s25 = sshll.u32 (%p692_p5), %s677_s18, 4 }
  0x25   : > { %s571_s13 = sshll.u32 %s265_s12, 4  ;;  %s409_s28 = scalar_lea.vmem (%p692_p5), %s744_s2, %s573_s25 }
  0x26   : > { %325 = vmatpush1.bf16.msra.mxu0 %v606_v10  ;;  %s268_s17 = scalar_lea.vmem %s745_s3, %s571_s13  ;;  %s273_s24 = scalar_lea.vmem %s746_s4, %s571_s13 }
  0x27   : > { %326 = vmatprep.subr.bf16.mxu0 %v607_v11 }
  0x2a   : > { %327 = vmatpush1.bf16.msra.mxu0 %v609_v12 }
  0x2d   : > { %564 = vmatmul.mubr.msk.bf16.vlgmr.msra.gmra.mrb[0].mxu0 %vm318_vm0, %v610_v13 }
 0x100   : > { %v356_v14 = vpop.f32.mrb[0].mxu0 }
 0x101   : > { %365 = vst [vmem:[%s708_s11] sm:$0xff] %v356_v14  ;;  %v358_v15 = vpop.f32.mrb[1].mxu0  ;;  %v378_v16 = vmul.f32 %v356_v14, %v356_v14 }
 0x102   : > { %366 = vst [vmem:[%s708_s11 + $0x8] sm:$0xff] %v358_v15  ;;  %v360_v17 = vpop.f32.mrb[2].mxu0  ;;  %v369_v18 = vadd.f32 %v358_v15, %v356_v14  ;;  %v379_v19 = vmul.f32 %v358_v15, %v358_v15 }
 0x103   : > { %367 = vst [vmem:[%s708_s11 + $0x10] sm:$0xff] %v360_v17  ;;  %v362_v20 = vpop.f32.mrb[3].mxu0  ;;  %v380_v21 = vmul.f32 %v360_v17, %v360_v17 }
 0x104   : > { %368 = vst [vmem:[%s708_s11 + $0x18] sm:$0xff] %v362_v20  ;;  %v381_v22 = vmul.f32 %v362_v20, %v362_v20  ;;  %370 = vadd.xlane.f32.xlu0 %v369_v18  ;;  %v382_v23 = vadd.f32 %v379_v19, %v378_v16  ;;  %v372_v24 = vadd.f32 %v362_v20, %v360_v17 }
 0x106   : > { %383 = vadd.xlane.f32.xlu1 %v382_v23  ;;  %v385_v25 = vadd.f32 %v381_v22, %v380_v21 }
 0x108   : > { %373 = vadd.xlane.f32.xlu0 %v372_v24  ;;  %v422_v30 = vld [vmem:[%s708_s11] sm:$0xff] (%p692_p5) }
 0x109   : > { %v424_v31 = vld [vmem:[%s708_s11 + $0x8] sm:$0xff] (%p692_p5)  ;;  %423 = vst [vmem:[%s409_s28] sm:$0xff] (%p692_p5), %v422_v30 }
 0x10a   : > { %386 = vadd.xlane.f32.xlu1 %v385_v25  ;;  %v426_v32 = vld [vmem:[%s708_s11 + $0x10] sm:$0xff] (%p692_p5)  ;;  %425 = vst [vmem:[%s409_s28 + $0x8] sm:$0xff] (%p692_p5), %v424_v31 }
 0x10b   : > { %v428_v33 = vld [vmem:[%s708_s11 + $0x18] sm:$0xff] (%p692_p5)  ;;  %427 = vst [vmem:[%s409_s28 + $0x20] sm:$0xff] (%p692_p5), %v426_v32 }
 0x10c   : > { %429 = vst [vmem:[%s409_s28 + $0x28] sm:$0xff] (%p692_p5), %v428_v33 }
 0x191   : > { %v371_v26 = vpop.xlane.xlu0 %370 }
 0x192   : > { %376 = vst.msk [vmem:[%s268_s17] sm:$0xff] %vm375_vm1, %v371_v26  ;;  %406 = sbr.rel (!%p692_p5) target bundleno = 409 (0x199), region = 70 }
 0x193   : > { %v384_v27 = vpop.xlane.xlu1 %383 }
 0x194   : > { %388 = vst.msk [vmem:[%s273_s24] sm:$0xff] %vm375_vm1, %v384_v27 }
 0x195   : > { %v374_v28 = vpop.xlane.xlu0 %373 }
 0x196   : > { %377 = vst.msk [vmem:[%s268_s17 + $0x8] sm:$0xff] %vm375_vm1, %v374_v28 }
 0x197   : > { %v387_v29 = vpop.xlane.xlu1 %386 }
 0x198   : > { %389 = vst.msk [vmem:[%s273_s24 + $0x8] sm:$0xff] %vm375_vm1, %v387_v29 }
 0x199 PF: > { %p12_p11 = scmp.ge.s32.totalorder %s680_s19, 4   ;;  %s748_s15 = smov %s629_s16 }
 0x19a   : > { %s749_s16 = smov %s690_s22  ;;  %s750_s17 = smov %s680_s19 }
 0x19b   :  { %14 = sbr.rel (!%p12_p11) target bundleno = 2 (0x2), region = 148 }

</bundles_post_ra>
